<compile_context>
chip_gen: v5e
topology: v5e:2x2
jax: 0.10.0
libtpu: 0.0.40
codegen_flags: <defaults>
</compile_context>

<pallas_src>
import jax
import jax.numpy as jnp
from jax.experimental import pallas as pl
from jax.experimental.pallas import tpu as pltpu

_BN_EPS = 1e-5


# -----------------------------------------------------------------------------
# Kernel 1: Linear(no bias) + BatchNorm1d (training batch stats) + LeakyReLU,
#           fused per lane-dense output-feature block.
# -----------------------------------------------------------------------------
def _fc_bn_lrelu_kernel(x_ref, w_ref, g_ref, b_ref, a_ref):
    # x: (B, Din) bf16, w: (Din, blk) bf16 -> f32 accumulation on the MXU.
    h = jnp.dot(x_ref[...], w_ref[...], preferred_element_type=jnp.float32)

    # One-pass batch statistics over the batch (sublane) axis.
    n = h.shape[0]
    s = h.sum(axis=0, keepdims=True)
    ss = (h * h).sum(axis=0, keepdims=True)
    mean = s * (1.0 / n)
    var = jnp.maximum(ss * (1.0 / n) - mean * mean, 0.0)   # biased variance

    scale = g_ref[...] * jax.lax.rsqrt(var + _BN_EPS)
    shift = b_ref[...] - mean * scale
    a = h * scale + shift
    a = jnp.where(a > 0, a, 0.2 * a)                       # LeakyReLU(0.2)
    a_ref[...] = a.astype(a_ref.dtype)                     # bf16 activation out


# -----------------------------------------------------------------------------
# Kernel 2: Gaussian head — Linear(1024, 2*dim_z) with pre-split mean/logvar
#           halves + in-kernel reparameterization, per dim_z block.
# -----------------------------------------------------------------------------
def _gaussian_kernel(a_ref, wm_ref, wl_ref, bm_ref, bl_ref, eps_ref,
                     z_ref, mean_ref, logvar_ref):
    a = a_ref[...]                                          # (B, Dh) bf16
    m = jnp.dot(a, wm_ref[...], preferred_element_type=jnp.float32) + bm_ref[...]
    lv = jnp.dot(a, wl_ref[...], preferred_element_type=jnp.float32) + bl_ref[...]
    std = jnp.exp(0.5 * lv)
    z_ref[...] = m[None] + eps_ref[...] * std[None]         # (l, B, blk)
    mean_ref[...] = m
    logvar_ref[...] = lv


# -----------------------------------------------------------------------------
# Wrapper: parameter repacking (transpose / split / bf16 cast) + two gridded
# pallas_calls.  x is the encoder output, shape (B, 1024).
# -----------------------------------------------------------------------------
def qz_x_pallas(x, params, eps, *, blk_fc=256, blk_z=128):
    B, Din = x.shape
    Dh = params["w_fc"].shape[0]            # 1024
    Dz = params["w_g"].shape[0] // 2        # dim_z
    L = eps.shape[0]
    assert Dh % blk_fc == 0 and Dz % blk_z == 0

    cparams = pltpu.CompilerParams(
        dimension_semantics=("parallel",),
        vmem_limit_bytes=32 * 1024 * 1024)

    # bf16 MXU operands (f32 accumulation); weights pre-transposed / pre-split.
    x_bf = x.astype(jnp.bfloat16)
    wfc_t = jnp.transpose(params["w_fc"]).astype(jnp.bfloat16)      # (Din, Dh)
    g_bn = params["g_bn"].reshape(1, Dh).astype(jnp.float32)
    b_bn = params["b_bn"].reshape(1, Dh).astype(jnp.float32)

    wg_t = jnp.transpose(params["w_g"])                             # (Dh, 2*Dz)
    wm = wg_t[:, :Dz].astype(jnp.bfloat16)
    wl = wg_t[:, Dz:].astype(jnp.bfloat16)
    bm = params["b_g"][:Dz].reshape(1, Dz).astype(jnp.float32)
    bl = params["b_g"][Dz:].reshape(1, Dz).astype(jnp.float32)

    # ---- fc: Linear(bias=False) + BatchNorm1d + LeakyReLU(0.2) -------------
    a = pl.pallas_call(
        _fc_bn_lrelu_kernel,
        out_shape=jax.ShapeDtypeStruct((B, Dh), jnp.bfloat16),
        grid=(Dh // blk_fc,),
        in_specs=[
            pl.BlockSpec((B, Din), lambda j: (0, 0)),
            pl.BlockSpec((Din, blk_fc), lambda j: (0, j)),
            pl.BlockSpec((1, blk_fc), lambda j: (0, j)),
            pl.BlockSpec((1, blk_fc), lambda j: (0, j)),
        ],
        out_specs=pl.BlockSpec((B, blk_fc), lambda j: (0, j)),
        compiler_params=cparams,
    )(x_bf, wfc_t, g_bn, b_bn)

    # ---- Gaussian head: Linear(1024, 2*dim_z) + reparameterize -------------
    z_stacked, mean, logvar = pl.pallas_call(
        _gaussian_kernel,
        out_shape=(
            jax.ShapeDtypeStruct((L, B, Dz), jnp.float32),
            jax.ShapeDtypeStruct((B, Dz), jnp.float32),
            jax.ShapeDtypeStruct((B, Dz), jnp.float32),
        ),
        grid=(Dz // blk_z,),
        in_specs=[
            pl.BlockSpec((B, Dh), lambda j: (0, 0)),
            pl.BlockSpec((Dh, blk_z), lambda j: (0, j)),
            pl.BlockSpec((Dh, blk_z), lambda j: (0, j)),
            pl.BlockSpec((1, blk_z), lambda j: (0, j)),
            pl.BlockSpec((1, blk_z), lambda j: (0, j)),
            pl.BlockSpec((L, B, blk_z), lambda j: (0, 0, j)),
        ],
        out_specs=(
            pl.BlockSpec((L, B, blk_z), lambda j: (0, 0, j)),
            pl.BlockSpec((B, blk_z), lambda j: (0, j)),
            pl.BlockSpec((B, blk_z), lambda j: (0, j)),
        ),
        compiler_params=cparams,
    )(a, wm, wl, bm, bl, eps)

    # torch.stack(tmp, 0).squeeze()
    return jnp.squeeze(z_stacked), mean, logvar


# -----------------------------------------------------------------------------
# Pure-JAX reference (mirrors the PyTorch forward) for validation.
# matmul_dtype=bf16 reproduces the kernel's mixed precision exactly;
# matmul_dtype=f32 is the "pure" PyTorch-style reference (looser tolerance).
# -----------------------------------------------------------------------------
def qz_x_reference(x, params, eps, matmul_dtype=jnp.float32):
    def mm(a, b):
        return jnp.dot(a.astype(matmul_dtype), b.astype(matmul_dtype),
                       preferred_element_type=jnp.float32)

    dz = params["w_g"].shape[0] // 2
    h = mm(x, params["w_fc"].T)                                   # Linear, no bias
    mu = jnp.mean(h, axis=0, keepdims=True)
    var = jnp.mean((h - mu) ** 2, axis=0, keepdims=True)          # biased variance
    a = (h - mu) * jax.lax.rsqrt(var + _BN_EPS)
    a = a * params["g_bn"][None, :] + params["b_bn"][None, :]
    a = jnp.where(a > 0, a, 0.2 * a)                              # LeakyReLU(0.2)
    logits = mm(a, params["w_g"].T) + params["b_g"][None, :]
    mean, logvar = logits[:, :dz], logits[:, dz:]
    z = mean[None] + eps * jnp.exp(0.5 * logvar)[None]
    return jnp.squeeze(z), mean, logvar


# -----------------------------------------------------------------------------
if __name__ == "__main__":
    key = jax.random.PRNGKey(0)
    ks = jax.random.split(key, 8)

    B, Din, Dz, L = 8, 1024, 512, 1   # Qz_x: fc is 1024->1024, dim_z=512, l=1
    s = 1.0 / (Din ** 0.5)

    params = {
        "w_fc": s * jax.random.normal(ks[0], (Din, Din), jnp.float32),
        "g_bn": 1.0 + 0.1 * jax.random.normal(ks[1], (Din,), jnp.float32),
        "b_bn": 0.1 * jax.random.normal(ks[2], (Din,), jnp.float32),
        "w_g": s * jax.random.normal(ks[3], (2 * Dz, Din), jnp.float32),
        "b_g": 0.1 * jax.random.normal(ks[4], (2 * Dz,), jnp.float32),
    }
    x = jax.random.normal(ks[5], (B, Din), jnp.float32)        # encoder output
    eps = jax.random.normal(ks[6], (L, B, Dz), jnp.float32)    # reparam noise

    z, mean, logvar = jax.block_until_ready(qz_x_pallas(x, params, eps))

    # Reference with identical mixed precision (bf16 MXU operands, f32 acc).
    z_ref, mean_ref, logvar_ref = jax.block_until_ready(
        qz_x_reference(x, params, eps, matmul_dtype=jnp.bfloat16))
    # Full-f32 reference for a looser sanity bound.
    z_f32, mean_f32, logvar_f32 = jax.block_until_ready(
        qz_x_reference(x, params, eps, matmul_dtype=jnp.float32))

    assert z.shape == (B, Dz) and mean.shape == (B, Dz) and logvar.shape == (B, Dz)

    for got, ref in ((z, z_ref), (mean, mean_ref), (logvar, logvar_ref)):
        err = float(jnp.max(jnp.abs(got - ref)))
        assert err < 5e-3, f"mismatch vs bf16-matmul reference: {err}"
    for got, ref in ((z, z_f32), (mean, mean_f32), (logvar, logvar_f32)):
        err = float(jnp.max(jnp.abs(got - ref)))
        assert err < 1e-1, f"mismatch vs f32 reference: {err}"
    assert bool(jnp.all(jnp.isfinite(z)))
    assert bool(jnp.all(jnp.isfinite(mean)))
    assert bool(jnp.all(jnp.isfinite(logvar)))

    print("KERNEL_OK")
</pallas_src>

<mosaic_0001>
module attributes {stable_mosaic.version = 11 : i64} {
  func.func @_fc_bn_lrelu_kernel(%arg0: i32, %arg1: memref<8x1024xbf16, #tpu.memory_space<vmem>>, %arg2: memref<1024x256xbf16, #tpu.memory_space<vmem>>, %arg3: memref<1x256xf32, #tpu.memory_space<vmem>>, %arg4: memref<1x256xf32, #tpu.memory_space<vmem>>, %arg5: memref<8x256xbf16, #tpu.memory_space<vmem>>) attributes {dimension_semantics = [#tpu.dimension_semantics<parallel>], iteration_bounds = array<i64: 4>, scalar_prefetch = 0 : i64, scratch_operands = 0 : i64, tpu.core_type = #tpu.core_type<tc>, window_params = [{pipeline_mode = #tpu.pipeline_mode<synchronous>, transform_indices = @transform_0, window_bounds = array<i64: 8, 1024>}, {transform_indices = @transform_1, window_bounds = array<i64: 1024, 256>}, {transform_indices = @transform_2, window_bounds = array<i64: 1, 256>}, {transform_indices = @transform_3, window_bounds = array<i64: 1, 256>}, {transform_indices = @transform_4, window_bounds = array<i64: 8, 256>}]} {
    %c0 = arith.constant 0 : index
    %c0_0 = arith.constant 0 : index
    %0 = vector.load %arg1[%c0, %c0_0] : memref<8x1024xbf16, #tpu.memory_space<vmem>>, vector<8x1024xbf16>
    %c0_1 = arith.constant 0 : index
    %c0_2 = arith.constant 0 : index
    %1 = vector.load %arg2[%c0_1, %c0_2] : memref<1024x256xbf16, #tpu.memory_space<vmem>>, vector<1024x256xbf16>
    %cst = arith.constant dense<0.000000e+00> : vector<8x256xf32>
    %2 = tpu.matmul %0, %1, %cst {dimension_numbers = #tpu.dot_dimension_numbers<[1], [0], [0], [1], [0, 0, 1, 1], [], []>} : vector<8x1024xbf16>, vector<1024x256xbf16>, vector<8x256xf32> -> vector<8x256xf32>
    %cst_3 = arith.constant dense<0.000000e+00> : vector<256xf32>
    %3 = vector.multi_reduction <add>, %2, %cst_3 [0] : vector<8x256xf32> to vector<256xf32>
    %4 = vector.shape_cast %3 : vector<256xf32> to vector<1x256xf32>
    %5 = arith.mulf %2, %2 : vector<8x256xf32>
    %cst_4 = arith.constant dense<0.000000e+00> : vector<256xf32>
    %6 = vector.multi_reduction <add>, %5, %cst_4 [0] : vector<8x256xf32> to vector<256xf32>
    %7 = vector.shape_cast %6 : vector<256xf32> to vector<1x256xf32>
    %cst_5 = arith.constant 1.250000e-01 : f32
    %8 = vector.broadcast %cst_5 : f32 to vector<1x256xf32>
    %9 = arith.mulf %4, %8 : vector<1x256xf32>
    %cst_6 = arith.constant 1.250000e-01 : f32
    %10 = vector.broadcast %cst_6 : f32 to vector<1x256xf32>
    %11 = arith.mulf %7, %10 : vector<1x256xf32>
    %12 = arith.mulf %9, %9 : vector<1x256xf32>
    %13 = arith.subf %11, %12 : vector<1x256xf32>
    %cst_7 = arith.constant 0.000000e+00 : f32
    %14 = vector.broadcast %cst_7 : f32 to vector<1x256xf32>
    %15 = arith.maximumf %13, %14 : vector<1x256xf32>
    %c0_8 = arith.constant 0 : index
    %c0_9 = arith.constant 0 : index
    %16 = vector.load %arg3[%c0_8, %c0_9] : memref<1x256xf32, #tpu.memory_space<vmem>>, vector<1x256xf32>
    %cst_10 = arith.constant 9.99999974E-6 : f32
    %17 = vector.broadcast %cst_10 : f32 to vector<1x256xf32>
    %18 = arith.addf %15, %17 : vector<1x256xf32>
    %19 = math.rsqrt %18 : vector<1x256xf32>
    %20 = arith.mulf %16, %19 : vector<1x256xf32>
    %c0_11 = arith.constant 0 : index
    %c0_12 = arith.constant 0 : index
    %21 = vector.load %arg4[%c0_11, %c0_12] : memref<1x256xf32, #tpu.memory_space<vmem>>, vector<1x256xf32>
    %22 = arith.mulf %9, %20 : vector<1x256xf32>
    %23 = arith.subf %21, %22 : vector<1x256xf32>
    %24 = vector.broadcast %20 : vector<1x256xf32> to vector<8x256xf32>
    %25 = arith.mulf %2, %24 : vector<8x256xf32>
    %26 = vector.broadcast %23 : vector<1x256xf32> to vector<8x256xf32>
    %27 = arith.addf %25, %26 : vector<8x256xf32>
    %cst_13 = arith.constant 0.000000e+00 : f32
    %28 = vector.broadcast %cst_13 : f32 to vector<8x256xf32>
    %29 = arith.cmpf ogt, %27, %28 : vector<8x256xf32>
    %cst_14 = arith.constant 2.000000e-01 : f32
    %30 = vector.broadcast %cst_14 : f32 to vector<8x256xf32>
    %31 = arith.mulf %30, %27 : vector<8x256xf32>
    %32 = arith.select %29, %27, %31 : vector<8x256xi1>, vector<8x256xf32>
    %33 = arith.truncf %32 : vector<8x256xf32> to vector<8x256xbf16>
    %c0_15 = arith.constant 0 : index
    %c0_16 = arith.constant 0 : index
    %34 = vector.load %arg5[%c0_15, %c0_16] : memref<8x256xbf16, #tpu.memory_space<vmem>>, vector<8x256xbf16>
    tpu.vector_store %arg5[%c0_15, %c0_16], %33 {strides = array<i32>} : memref<8x256xbf16, #tpu.memory_space<vmem>>, vector<8x256xbf16>,
    return
  }
  func.func @transform_0(%arg0: i32) -> (i32, i32) {
    %c0_i32 = arith.constant 0 : i32
    %c0_i32_0 = arith.constant 0 : i32
    %c0_i32_1 = arith.constant 0 : i32
    return %c0_i32, %c0_i32_0 : i32, i32
  }
  func.func @transform_1(%arg0: i32) -> (i32, i32) {
    %c0_i32 = arith.constant 0 : i32
    %c0_i32_0 = arith.constant 0 : i32
    return %c0_i32, %arg0 : i32, i32
  }
  func.func @transform_2(%arg0: i32) -> (i32, i32) {
    %c0_i32 = arith.constant 0 : i32
    %c0_i32_0 = arith.constant 0 : i32
    return %c0_i32, %arg0 : i32, i32
  }
  func.func @transform_3(%arg0: i32) -> (i32, i32) {
    %c0_i32 = arith.constant 0 : i32
    %c0_i32_0 = arith.constant 0 : i32
    return %c0_i32, %arg0 : i32, i32
  }
  func.func @transform_4(%arg0: i32) -> (i32, i32) {
    %c0_i32 = arith.constant 0 : i32
    %c0_i32_0 = arith.constant 0 : i32
    return %c0_i32, %arg0 : i32, i32
  }
}

</mosaic_0001>

<bundles_post_ra>
// kernel: tpu_custom_call.1
= control target key start
LH: loop header
LB: loop body
LE: loop exit
PB: predicated region body
PF: predicated region fallthrough
CT: control target
= control target key end

     0   :  { %s3028_s0 = inlined_call_operand.hbm [shape: bf16[8,1024], index: 0, kind: input, shape index: {}]   ;;  %s3029_s1 = inlined_call_operand.hbm [shape: bf16[1024,1024], index: 1, kind: input, shape index: {}]   ;;  %s3030_s2 = inlined_call_operand.hbm [shape: f32[1,1024], index: 2, kind: input, shape index: {}]   ;;  %s3031_s3 = inlined_call_operand.hbm [shape: f32[1,1024], index: 3, kind: input, shape index: {}]   ;;  %s3032_s4 = inlined_call_operand.hbm [shape: bf16[8,1024], index: 4, kind: output, shape index: {}]  }
   0x1   :  { %3033 = sst [smem:[#allocation16_spill]] %s3028_s0 }
   0x2   :  { %3034 = sst [smem:[#allocation17_spill]] %s3029_s1 }
   0x3   :  { %9 = vsyncpa [#allocation3], 0 }
   0x4   :  { %10 = vsyncpa [#allocation6], 0 }
   0x5   :  { %12 = vsyncpa [#allocation6 + $0x1], 0 }
   0x6   :  { %13 = vsyncpa [#allocation9], 0 }
   0x7   :  { %15 = vsyncpa [#allocation9 + $0x1], 0 }
   0x8   :  { %16 = vsyncpa [#allocation4], 0 }
   0x9   :  { %18 = vsyncpa [#allocation4 + $0x1], 0  ;;  %s2522_s15 = smov 0   ;;  %s2524_s16 = smov 0  }
   0xa   :  { %s2526_s17 = smov 0   ;;  %s2528_s18 = smov 0  }
   0xb LB: > { %s2543_s19 = sadd.s32 1, %s2491_s18   ;;  %s52_s20 = sadd.s32 1, %s2487_s17  ;;  %s2491_s18 = sphi %s2528_s18, %s3047_s18   ;;  %s2487_s17 = sphi %s2526_s17, %s3046_s17   ;;  %s2483_s16 = sphi %s2524_s16, %s3045_s16   ;;  %s2479_s15 = sphi %s2522_s15, %s3044_s15  }
   0xc   : > { %s49_s21 = ssub.s32 %s2491_s18, %s2543_s19  ;;  %p59_p0 = scmp.ne.s32.totalorder %s2487_s17, %s2483_s16 }
   0xd   : > { %p50_p1 = scmp.eq.s32.totalorder %s49_s21, 0  ;;  %p60_p2 = scmp.eq.s32.totalorder %s2491_s18, 0 }
   0xe   : > { %p2254_p3 = scmp.lt.s32.totalorder %s2491_s18, 4  ;;  %s179_s23 = sand.u32 1, %s2491_s18  }
   0xf   : > { %s2553_s22 = scalar_select %p50_p1, %s2487_s17, %s52_s20  }
  0x10   : > { %p61_p4 = por %p60_p2, %p59_p0  ;;  %s2560_s24 = sand.u32 1, %s2487_s17  }
  0x11   : > { %3035 = sst [smem:[#allocation15_spill]] %s2553_s22  ;;  %s1563_s25 = sshll.u32 %s2560_s24, 10 }
  0x12   : > { %s2093_s26 = sshll.u32 %s2491_s18, 3  ;;  %s3036_s1 = sld [smem:[#allocation17_spill]] }
  0x13   : > { %s183_s5 = scalar_lea.vmem [#allocation5], %s1563_s25  ;;  %p2569_p5 = pnand %p2254_p3, %p61_p4 }
  0x14   : > { %s191_s6 = sshll.u32 %s183_s5, 4  ;;  %s2573_s8 = scalar_lea.sflag [#allocation6], %s179_s23  ;;  %s192_s6 = int_to_ptr.vmem [resolvable:$true] %s191_s6 }
  0x15   : > { %p2301_p7 = pneg %p2569_p5 }
  0x18   : > { %s188_s29 = scalar_lea.hbm %s3036_s1, %s2093_s26  ;;  %s2304_s13 = scalar_lea.hbm %s3036_s1, 4096 }
  0x19   : > { %s189_s30 = sshll.u32 %s188_s29, 4  ;;  %s190_s30 = int_to_ptr.hbm [resolvable:$true] %s189_s30 }
  0x1a   : > { %s2297_s9 = sshra.s32 %s190_s30, 4  ;;  %s2298_s9 = int_to_ptr.hbm [resolvable:$true] %s2297_s9 }
  0x1b   : > { %s2299_s10 = scalar_lea.hbm %s2298_s9, 1024  ;;  %p2305_p10 = scmp.lt.s32.totalorder %s2298_s9, %s3036_s1 }
  0x1c   : > { %p2300_p6 = scmp.ne.s32.totalorder %s2298_s9, %s2299_s10  ;;  %p2306_p11 = scmp.lt.s32.totalorder %s2304_s13, %s2299_s10 }
  0x1e   : > { %p2302_p8 = pnand %p2301_p7, %p2300_p6  ;;  %p2307_p12 = por %p2306_p11, %p2305_p10 }
  0x20   : > { %p2303_p9 = pneg %p2302_p8 }
  0x22   : > { %p2308_p13 = pnand %p2307_p12, %p2303_p9 }
  0x24   : > { %2311 = shalt.err (!%p2308_p13)
}
  0x25   : > { %s2493_s21 = smov 512   ;;  %s2494_s23 = smov 128  }
  0x26   : > { %s2495_s25 = smov 8   ;;  %s2590_s26 = sadd.s32 4294967295, %s2491_s18  }
  0x27   : > { %2242 = dma.hbm_to_vmem [thread:$0]  (!%p2569_p5), %s190_s30, 16384, %s192_s6, %s2573_s8, %s2493_s21, %s2494_s23, %s2495_s25  }
  0x28   : > { %s1559_s27 = sadd.s32 4294967294, %s2491_s18   ;;  %p65_p1 = scmp.ne.s32.totalorder %s2483_s16, %s2479_s15 }
  0x29   : > { %p66_p2 = scmp.eq.s32.totalorder %s2590_s26, 0  ;;  %p141_p3 = scmp.eq.s32.totalorder %s2590_s26, 3 }
  0x2a   : > { %p147_p4 = scmp.eq.s32.totalorder %s1559_s27, 3  ;;  %p1560_p6 = scmp.ge.s32.totalorder %s2491_s18, 1 }
  0x2b   : > { %p2600_p8 = por %p66_p2, %p65_p1  ;;  %p2607_p9 = por %p141_p3, %p59_p0 }
  0x2c   : > { %p2611_p10 = por %p147_p4, %p65_p1  ;;  %p154_p11 = scmp.lt.s32.totalorder %s2491_s18, 5 }
  0x2d   : > { %s3041_s0 = sld [smem:[#allocation16_spill]]  ;;  %s1566_s11 = sshll.u32 %s2560_s24, 1 }
  0x2e   : > { %p2619_p12 = pnand %p1560_p6, %p154_p11  ;;  %s2496_s12 = smov [#allocation2]  }
  0x2f   : > { %s168_s13 = sshll.u32 %s2496_s12, 4  ;;  %s1567_s14 = sshll.u32 %s2491_s18, 1  ;;  %s169_s13 = int_to_ptr.vmem [resolvable:$true] %s168_s13 }
  0x30   : > { %p2235_p0 = pneg %p2619_p12  ;;  %s209_s23 = scalar_lea.hbm %s3030_s2, %s1567_s14 }
  0x31   : > { %s205_s25 = scalar_lea.vmem [#allocation7], %s1566_s11  ;;  %s211_s5 = sshll.u32 %s209_s23, 4  ;;  %s212_s5 = int_to_ptr.hbm [resolvable:$true] %s211_s5 }
  0x32   : > { %p2236_p13 = pnand %p2235_p0, %p66_p2  ;;  %s213_s27 = sshll.u32 %s205_s25, 4  ;;  %s214_s27 = int_to_ptr.vmem [resolvable:$true] %s213_s27 }
  0x33   : > { %s166_s9 = sshll.u32 %s3041_s0, 4  ;;  %s2357_s6 = sshra.s32 %s212_s5, 4  ;;  %s167_s9 = int_to_ptr.hbm [resolvable:$true] %s166_s9  ;;  %s2358_s6 = int_to_ptr.hbm [resolvable:$true] %s2357_s6 }
  0x34   : > { %2238 = dma.hbm_to_vmem [thread:$0]  (!%p2236_p13), %s167_s9, 512, %s169_s13, [#allocation3]  }
  0x35   : > { %s2359_s0 = scalar_lea.hbm %s2358_s6, 2  ;;  %s2364_s22 = scalar_lea.hbm %s3030_s2, 8 }
  0x36   : > { %p2360_p1 = scmp.ne.s32.totalorder %s2358_s6, %s2359_s0  ;;  %p2365_p6 = scmp.lt.s32.totalorder %s2358_s6, %s3030_s2 }
  0x37   : > { %p2366_p11 = scmp.lt.s32.totalorder %s2364_s22, %s2359_s0 }
  0x38   : > { %p2362_p3 = pnand %p2360_p1, %p2301_p7 }
  0x39   : > { %p2367_p0 = por %p2366_p11, %p2365_p6 }
  0x3a   : > { %p2363_p4 = pneg %p2362_p3 }
  0x3c   : > { %p2368_p13 = pnand %p2367_p0, %p2363_p4 }
  0x3e   : > { %2371 = shalt.err (!%p2368_p13)
}
  0x3f   : > { %2245 = dma.hbm_to_vmem [thread:$0]  (!%p2569_p5), %s212_s5, 32, %s214_s27, %s2573_s8  }
  0x40   : > { %s228_s23 = scalar_lea.hbm %s3031_s3, %s1567_s14  ;;  %s224_s1 = scalar_lea.vmem [#allocation8], %s1566_s11 }
  0x41   : > { %s232_s25 = sshll.u32 %s224_s1, 4  ;;  %s230_s12 = sshll.u32 %s228_s23, 4  ;;  %s233_s25 = int_to_ptr.vmem [resolvable:$true] %s232_s25  ;;  %s231_s12 = int_to_ptr.hbm [resolvable:$true] %s230_s12 }
  0x42   : > { %s221_s6 = scalar_lea.sflag [#allocation9], %s2560_s24  ;;  %s2387_s0 = sshra.s32 %s231_s12, 4  ;;  %s2388_s0 = int_to_ptr.hbm [resolvable:$true] %s2387_s0 }
  0x43   : > { %s2389_s22 = scalar_lea.hbm %s2388_s0, 2  ;;  %s2394_s27 = scalar_lea.hbm %s3031_s3, 8 }
  0x44   : > { %p2390_p1 = scmp.ne.s32.totalorder %s2388_s0, %s2389_s22  ;;  %p2395_p6 = scmp.lt.s32.totalorder %s2388_s0, %s3031_s3 }
  0x45   : > { %p2396_p11 = scmp.lt.s32.totalorder %s2394_s27, %s2389_s22 }
  0x46   : > { %p2392_p3 = pnand %p2390_p1, %p2301_p7 }
  0x47   : > { %p2397_p0 = por %p2396_p11, %p2395_p6 }
  0x48   : > { %p2393_p4 = pneg %p2392_p3 }
  0x4a   : > { %p2398_p13 = pnand %p2397_p0, %p2393_p4 }
  0x4c   : > { %2401 = shalt.err (!%p2398_p13)
}
  0x4d   : > { %2248 = dma.hbm_to_vmem [thread:$0]  (!%p2569_p5), %s231_s12, 32, %s233_s25, %s221_s6  }
  0x4e   : > { %241 = sbr.rel (%p2619_p12) target bundleno = 425 (0x1a9), region = 36 }
  0x53   : > { %2462 = dma.done.wait (%p66_p2), [#allocation3], 512  }
  0x54   : > { %2464 = vsyncadd (%p66_p2), [#allocation3], 4294966784  ;;  %s248_s24 = sand.u32 1, %s2590_s26   ;;  %s2667_s11 = sand.u32 1, %s2483_s16  }
  0x55   : > { %s1572_s21 = sshll.u32 %s2667_s11, 10  ;;  %s249_s9 = scalar_lea.sflag [#allocation6], %s248_s24 }
  0x56   : > { %s2670_s7 = scalar_lea.vmem [#allocation5], %s1572_s21 }
  0x57   : > { %2466 = dma.done.wait (%p2600_p8), %s249_s9, 16416  }
  0x58   : > { %2468 = vsyncadd (%p2600_p8), %s249_s9, 4294950880  ;;  %s1573_s10 = sshll.u32 %s2667_s11, 1  ;;  %s269_s23 = scalar_lea.sflag [#allocation9], %s2667_s11 }
  0x59   : > { %s2677_s13 = scalar_lea.vmem [#allocation7], %s1573_s10  ;;  %s2680_s1 = scalar_lea.vmem [#allocation8], %s1573_s10 }
  0x5a   : > { %2470 = dma.done.wait (%p2600_p8), %s269_s23, 32  }
  0x5b   : > { %2472 = vsyncadd (%p2600_p8), %s269_s23, 4294967264  ;;  %v1634_v0 = vld [vmem:[%s2670_s7 + $0x70] sm:$0xf]  ;;  %v2109_v1 = vld [vmem:[%s2670_s7 + $0x74] sm:$0xf0]  ;;  %vm1382_vm5 = vcmask 1040384  }
  0x5c   : > { %v1698_v2 = vld [vmem:[%s2670_s7 + $0xf0] sm:$0xf]  ;;  %v1635_v3 = vor.u32 %v2109_v1, %v1634_v0  ;;  %v2125_v4 = vld [vmem:[%s2670_s7 + $0xf4] sm:$0xf0]  ;;  %v1626_v11 = vld [vmem:[%s2670_s7 + $0x60] sm:$0xf] }
  0x5d   : > { %v1762_v5 = vld [vmem:[%s2670_s7 + $0x170] sm:$0xf]  ;;  %v2141_v6 = vld [vmem:[%s2670_s7 + $0x174] sm:$0xf0]  ;;  %v1699_v7 = vor.u32 %v2125_v4, %v1698_v2  ;;  %v2107_v13 = vld [vmem:[%s2670_s7 + $0x64] sm:$0xf0] }
  0x5e   : > { %v1763_v8 = vor.u32 %v2141_v6, %v1762_v5  ;;  %v1826_v9 = vld [vmem:[%s2670_s7 + $0x1f0] sm:$0xf]  ;;  %v2157_v10 = vld [vmem:[%s2670_s7 + $0x1f4] sm:$0xf0]  ;;  %1112 = vmatpush.bf16.msra.mxu0 %v1635_v3  ;;  %v1690_v14 = vld [vmem:[%s2670_s7 + $0xe0] sm:$0xf]  ;;  %v1627_v16 = vor.u32 %v2107_v13, %v1626_v11 }
  0x5f   : > { %v1827_v12 = vor.u32 %v2157_v10, %v1826_v9  ;;  %v2123_v15 = vld [vmem:[%s2670_s7 + $0xe4] sm:$0xf0]  ;;  %1125 = vmatpush.bf16.msra.mxu1 %v1699_v7  ;;  %v1754_v18 = vld [vmem:[%s2670_s7 + $0x160] sm:$0xf]  ;;  %v1618_v23 = vld [vmem:[%s2670_s7 + $0x50] sm:$0xf] }
  0x60   : > { %1138 = vmatpush.bf16.msra.mxu2 %v1763_v8  ;;  %v1691_v17 = vor.u32 %v2123_v15, %v1690_v14  ;;  %v2139_v19 = vld [vmem:[%s2670_s7 + $0x164] sm:$0xf0]  ;;  %v1818_v20 = vld [vmem:[%s2670_s7 + $0x1e0] sm:$0xf]  ;;  %v2105_v24 = vld [vmem:[%s2670_s7 + $0x54] sm:$0xf0] }
  0x61   : > { %1151 = vmatpush.bf16.msra.mxu3 %v1827_v12  ;;  %v1755_v21 = vor.u32 %v2139_v19, %v1754_v18  ;;  %v2155_v22 = vld [vmem:[%s2670_s7 + $0x1e4] sm:$0xf0]  ;;  %v1682_v26 = vld [vmem:[%s2670_s7 + $0xd0] sm:$0xf]  ;;  %v2121_v27 = vld [vmem:[%s2670_s7 + $0xd4] sm:$0xf0]  ;;  %v1619_v29 = vor.u32 %v2105_v24, %v1618_v23 }
  0x62   : > { %v1819_v25 = vor.u32 %v2155_v22, %v1818_v20  ;;  %v1746_v28 = vld [vmem:[%s2670_s7 + $0x150] sm:$0xf]  ;;  %1113 = vmatpush.bf16.msra.mxu0 %v1627_v16  ;;  %v2137_v30 = vld [vmem:[%s2670_s7 + $0x154] sm:$0xf0]  ;;  %v1683_v33 = vor.u32 %v2121_v27, %v1682_v26  ;;  %v1610_v35 = vld [vmem:[%s2670_s7 + $0x40] sm:$0xf] }
  0x63   : > { %v1810_v31 = vld [vmem:[%s2670_s7 + $0x1d0] sm:$0xf]  ;;  %v2153_v32 = vld [vmem:[%s2670_s7 + $0x1d4] sm:$0xf0]  ;;  %1126 = vmatpush.bf16.msra.mxu1 %v1691_v17  ;;  %v1747_v34 = vor.u32 %v2137_v30, %v1746_v28  ;;  %v2103_v36 = vld [vmem:[%s2670_s7 + $0x44] sm:$0xf0] }
  0x64   : > { %1139 = vmatpush.bf16.msra.mxu2 %v1755_v21  ;;  %v1674_v37 = vld [vmem:[%s2670_s7 + $0xc0] sm:$0xf]  ;;  %v1811_v38 = vor.u32 %v2153_v32, %v1810_v31  ;;  %v2119_v39 = vld [vmem:[%s2670_s7 + $0xc4] sm:$0xf0]  ;;  %v1611_v44 = vor.u32 %v2103_v36, %v1610_v35  ;;  %v1602_v47 = vld [vmem:[%s2670_s7 + $0x30] sm:$0xf] }
  0x65   : > { %1152 = vmatpush.bf16.msra.mxu3 %v1819_v25  ;;  %v1738_v40 = vld [vmem:[%s2670_s7 + $0x140] sm:$0xf]  ;;  %v2135_v41 = vld [vmem:[%s2670_s7 + $0x144] sm:$0xf0]  ;;  %v1675_v45 = vor.u32 %v2119_v39, %v1674_v37  ;;  %v2101_v48 = vld [vmem:[%s2670_s7 + $0x34] sm:$0xf0] }
  0x66   : > { %v1802_v42 = vld [vmem:[%s2670_s7 + $0x1c0] sm:$0xf]  ;;  %v2151_v43 = vld [vmem:[%s2670_s7 + $0x1c4] sm:$0xf0]  ;;  %1114 = vmatpush.bf16.msra.mxu0 %v1619_v29  ;;  %v1739_v46 = vor.u32 %v2135_v41, %v1738_v40  ;;  %v1666_v49 = vld [vmem:[%s2670_s7 + $0xb0] sm:$0xf]  ;;  %v1603_v56 = vor.u32 %v2101_v48, %v1602_v47 }
  0x67   : > { %1127 = vmatpush.bf16.msra.mxu1 %v1683_v33  ;;  %v1803_v50 = vor.u32 %v2151_v43, %v1802_v42  ;;  %v2117_v51 = vld [vmem:[%s2670_s7 + $0xb4] sm:$0xf0]  ;;  %v1730_v52 = vld [vmem:[%s2670_s7 + $0x130] sm:$0xf]  ;;  %v1594_v59 = vld [vmem:[%s2670_s7 + $0x20] sm:$0xf] }
  0x68   : > { %1140 = vmatpush.bf16.msra.mxu2 %v1747_v34  ;;  %v2133_v53 = vld [vmem:[%s2670_s7 + $0x134] sm:$0xf0]  ;;  %v1794_v54 = vld [vmem:[%s2670_s7 + $0x1b0] sm:$0xf]  ;;  %v1667_v57 = vor.u32 %v2117_v51, %v1666_v49  ;;  %v2099_v60 = vld [vmem:[%s2670_s7 + $0x24] sm:$0xf0] }
  0x69   : > { %1153 = vmatpush.bf16.msra.mxu3 %v1811_v38  ;;  %v2149_v55 = vld [vmem:[%s2670_s7 + $0x1b4] sm:$0xf0]  ;;  %v1731_v58 = vor.u32 %v2133_v53, %v1730_v52  ;;  %v1658_v61 = vld [vmem:[%s2670_s7 + $0xa0] sm:$0xf]  ;;  %v2115_v63 = vld [vmem:[%s2670_s7 + $0xa4] sm:$0xf0]  ;;  %v1595_v4 = vor.u32 %v2099_v60, %v1594_v59 }
  0x6a   : > { %1115 = vmatpush.bf16.msra.mxu0 %v1611_v44  ;;  %v1795_v62 = vor.u32 %v2149_v55, %v1794_v54  ;;  %v1722_v0 = vld [vmem:[%s2670_s7 + $0x120] sm:$0xf]  ;;  %v2131_v1 = vld [vmem:[%s2670_s7 + $0x124] sm:$0xf0]  ;;  %v1659_v5 = vor.u32 %v2115_v63, %v1658_v61  ;;  %v1586_v7 = vld [vmem:[%s2670_s7 + $0x10] sm:$0xf] }
  0x6b   : > { %1128 = vmatpush.bf16.msra.mxu1 %v1675_v45  ;;  %v1786_v2 = vld [vmem:[%s2670_s7 + $0x1a0] sm:$0xf]  ;;  %v2147_v3 = vld [vmem:[%s2670_s7 + $0x1a4] sm:$0xf0]  ;;  %v1723_v6 = vor.u32 %v2131_v1, %v1722_v0  ;;  %v2097_v8 = vld [vmem:[%s2670_s7 + $0x14] sm:$0xf0] }
  0x6c   : > { %1141 = vmatpush.bf16.msra.mxu2 %v1739_v46  ;;  %v1650_v9 = vld [vmem:[%s2670_s7 + $0x90] sm:$0xf]  ;;  %v1787_v10 = vor.u32 %v2147_v3, %v1786_v2  ;;  %v2113_v11 = vld [vmem:[%s2670_s7 + $0x94] sm:$0xf0]  ;;  %v1587_v16 = vor.u32 %v2097_v8, %v1586_v7  ;;  %v1578_v17 = vld [vmem:[%s2670_s7] sm:$0xf] }
  0x6d   : > { %1154 = vmatpush.bf16.msra.mxu3 %v1803_v50  ;;  %v1714_v12 = vld [vmem:[%s2670_s7 + $0x110] sm:$0xf]  ;;  %v2129_v13 = vld [vmem:[%s2670_s7 + $0x114] sm:$0xf0]  ;;  %v2095_v18 = vld [vmem:[%s2670_s7 + $0x4] sm:$0xf0]  ;;  %v1651_v19 = vor.u32 %v2113_v11, %v1650_v9 }
  0x6e   : > { %1116 = vmatpush.bf16.msra.mxu0 %v1603_v56  ;;  %v1778_v14 = vld [vmem:[%s2670_s7 + $0x190] sm:$0xf]  ;;  %v2145_v15 = vld [vmem:[%s2670_s7 + $0x194] sm:$0xf0]  ;;  %v1715_v20 = vor.u32 %v2129_v13, %v1714_v12  ;;  %v1642_v21 = vld [vmem:[%s2670_s7 + $0x80] sm:$0xf]  ;;  %v1579_v31 = vor.u32 %v2095_v18, %v1578_v17 }
  0x6f   : > { %1129 = vmatpush.bf16.msra.mxu1 %v1667_v57  ;;  %v2111_v22 = vld [vmem:[%s2670_s7 + $0x84] sm:$0xf0]  ;;  %v1706_v23 = vld [vmem:[%s2670_s7 + $0x100] sm:$0xf]  ;;  %v1779_v24 = vor.u32 %v2145_v15, %v1778_v14  ;;  %v1890_v28 = vld [vmem:[%s2670_s7 + $0x270] sm:$0xf] }
  0x70   : > { %1142 = vmatpush.bf16.msra.mxu2 %v1731_v58  ;;  %v2127_v25 = vld [vmem:[%s2670_s7 + $0x104] sm:$0xf0]  ;;  %v1770_v26 = vld [vmem:[%s2670_s7 + $0x180] sm:$0xf]  ;;  %v2173_v29 = vld [vmem:[%s2670_s7 + $0x274] sm:$0xf0]  ;;  %v1643_v35 = vor.u32 %v2111_v22, %v1642_v21 }
  0x71   : > { %1155 = vmatpush.bf16.msra.mxu3 %v1795_v62  ;;  %v2143_v27 = vld [vmem:[%s2670_s7 + $0x184] sm:$0xf0]  ;;  %v1954_v30 = vld [vmem:[%s2670_s7 + $0x2f0] sm:$0xf]  ;;  %v2189_v32 = vld [vmem:[%s2670_s7 + $0x2f4] sm:$0xf0]  ;;  %v1707_v36 = vor.u32 %v2127_v25, %v1706_v23  ;;  %v1891_v40 = vor.u32 %v2173_v29, %v1890_v28 }
  0x72   : > { %1117 = vmatpush.bf16.msra.mxu0 %v1595_v4  ;;  %v2018_v33 = vld [vmem:[%s2670_s7 + $0x370] sm:$0xf]  ;;  %v2205_v34 = vld [vmem:[%s2670_s7 + $0x374] sm:$0xf0]  ;;  %v1771_v39 = vor.u32 %v2143_v27, %v1770_v26  ;;  %v1955_v41 = vor.u32 %v2189_v32, %v1954_v30  ;;  %v1882_v43 = vld [vmem:[%s2670_s7 + $0x260] sm:$0xf] }
  0x73   : > { %1130 = vmatpush.bf16.msra.mxu1 %v1659_v5  ;;  %v2082_v37 = vld [vmem:[%s2670_s7 + $0x3f0] sm:$0xf]  ;;  %v2221_v38 = vld [vmem:[%s2670_s7 + $0x3f4] sm:$0xf0]  ;;  %v2019_v42 = vor.u32 %v2205_v34, %v2018_v33  ;;  %v2171_v44 = vld [vmem:[%s2670_s7 + $0x264] sm:$0xf0] }
  0x74   : > { %1143 = vmatpush.bf16.msra.mxu2 %v1723_v6  ;;  %v1946_v45 = vld [vmem:[%s2670_s7 + $0x2e0] sm:$0xf]  ;;  %v2083_v46 = vor.u32 %v2221_v38, %v2082_v37  ;;  %v2187_v47 = vld [vmem:[%s2670_s7 + $0x2e4] sm:$0xf0]  ;;  %v1883_v53 = vor.u32 %v2171_v44, %v1882_v43  ;;  %v1874_v54 = vld [vmem:[%s2670_s7 + $0x250] sm:$0xf] }
  0x75   : > { %1156 = vmatpush.bf16.msra.mxu3 %v1787_v10  ;;  %v2010_v48 = vld [vmem:[%s2670_s7 + $0x360] sm:$0xf]  ;;  %v2203_v49 = vld [vmem:[%s2670_s7 + $0x364] sm:$0xf0]  ;;  %v1947_v57 = vor.u32 %v2187_v47, %v1946_v45  ;;  %v2169_v59 = vld [vmem:[%s2670_s7 + $0x254] sm:$0xf0] }
  0x76   : > { %1118 = vmatpush.bf16.msra.mxu0 %v1587_v16  ;;  %v2074_v50 = vld [vmem:[%s2670_s7 + $0x3e0] sm:$0xf]  ;;  %v2219_v51 = vld [vmem:[%s2670_s7 + $0x3e4] sm:$0xf0]  ;;  %v2011_v58 = vor.u32 %v2203_v49, %v2010_v48  ;;  %v1938_v60 = vld [vmem:[%s2670_s7 + $0x2d0] sm:$0xf]  ;;  %v1875_v8 = vor.u32 %v2169_v59, %v1874_v54 }
  0x77   : > { %1131 = vmatpush.bf16.msra.mxu1 %v1651_v19  ;;  %v313_v52 = vld [vmem:[#allocation2 + $0x8] sm:$0xff]  ;;  %v2185_v61 = vld [vmem:[%s2670_s7 + $0x2d4] sm:$0xf0]  ;;  %v2075_v62 = vor.u32 %v2219_v51, %v2074_v50  ;;  %v2002_v63 = vld [vmem:[%s2670_s7 + $0x350] sm:$0xf]  ;;  %s1575_s28 = sshll.u32 %s2667_s11, 3 }
  0x78   : > { %1144 = vmatpush.bf16.msra.mxu2 %v1715_v20  ;;  %v450_v55 = vunpack.c.l.b16 %v313_v52  ;;  %v451_v56 = vunpack.c.h.b16 %v313_v52  ;;  %v2201_v0 = vld [vmem:[%s2670_s7 + $0x354] sm:$0xf0]  ;;  %v312_v2 = vld [vmem:[#allocation2] sm:$0xff]  ;;  %v2066_v3 = vld [vmem:[%s2670_s7 + $0x3d0] sm:$0xf]  ;;  %v1939_v9 = vor.u32 %v2185_v61, %v1938_v60  ;;  %s2222_s25 = sshll.u32 %s2590_s26, 3 }
  0x79   : > { %1157 = vmatpush.bf16.msra.mxu3 %v1779_v24  ;;  %v2217_v4 = vld [vmem:[%s2670_s7 + $0x3d4] sm:$0xf0]  ;;  %v448_v5 = vunpack.c.l.b16 %v312_v2  ;;  %v449_v7 = vunpack.c.h.b16 %v312_v2  ;;  %v2003_v10 = vor.u32 %v2201_v0, %v2002_v63  ;;  %v1866_v11 = vld [vmem:[%s2670_s7 + $0x240] sm:$0xf]  ;;  %v2167_v12 = vld [vmem:[%s2670_s7 + $0x244] sm:$0xf0]  ;;  %s1429_s0 = scalar_lea.hbm %s3032_s4, %s2222_s25 }
  0x7a   : > { %1119 = vmatpush.bf16.msra.mxu0 %v1579_v31  ;;  %v2772_v1 = vpack.c.b16 %v450_v55, %v450_v55  ;;  %v2776_v6 = vpack.c.b16 %v451_v56, %v451_v56  ;;  %v1930_v13 = vld [vmem:[%s2670_s7 + $0x2c0] sm:$0xf]  ;;  %v2067_v16 = vor.u32 %v2217_v4, %v2066_v3  ;;  %v2183_v17 = vld [vmem:[%s2670_s7 + $0x2c4] sm:$0xf0]  ;;  %v1867_v22 = vor.u32 %v2167_v12, %v1866_v11  ;;  %v1858_v25 = vld [vmem:[%s2670_s7 + $0x230] sm:$0xf] }
  0x7b   : > { %1132 = vmatpush.bf16.msra.mxu1 %v1643_v35  ;;  %v2782_v14 = vpack.c.b16 %v448_v5, %v448_v5  ;;  %v2784_v15 = vpack.c.b16 %v449_v7, %v449_v7  ;;  %v1994_v18 = vld [vmem:[%s2670_s7 + $0x340] sm:$0xf]  ;;  %v2199_v19 = vld [vmem:[%s2670_s7 + $0x344] sm:$0xf0]  ;;  %v1931_v23 = vor.u32 %v2183_v17, %v1930_v13  ;;  %v2165_v26 = vld [vmem:[%s2670_s7 + $0x234] sm:$0xf0] }
  0x7c   : > { %1145 = vmatpush.bf16.msra.mxu2 %v1707_v36  ;;  %v2058_v20 = vld [vmem:[%s2670_s7 + $0x3c0] sm:$0xf]  ;;  %v2215_v21 = vld [vmem:[%s2670_s7 + $0x3c4] sm:$0xf0]  ;;  %v1995_v24 = vor.u32 %v2199_v19, %v1994_v18  ;;  %v1922_v27 = vld [vmem:[%s2670_s7 + $0x2b0] sm:$0xf]  ;;  %v1859_v34 = vor.u32 %v2165_v26, %v1858_v25 }
  0x7d   : > { %1158 = vmatpush.bf16.msra.mxu3 %v1771_v39  ;;  %1120 = vmatmul.bf16.vlgmr.msra.gmra.mxu0 %v2782_v14  ;;  %v2059_v28 = vor.u32 %v2215_v21, %v2058_v20  ;;  %v2181_v29 = vld [vmem:[%s2670_s7 + $0x2b4] sm:$0xf0]  ;;  %v1986_v30 = vld [vmem:[%s2670_s7 + $0x330] sm:$0xf]  ;;  %v1850_v37 = vld [vmem:[%s2670_s7 + $0x220] sm:$0xf] }
  0x7e   : > { %1164 = vmatpush.bf16.msrb.mxu0 %v1891_v40  ;;  %1133 = vmatmul.bf16.vlgmr.msra.gmra.mxu1 %v2784_v15  ;;  %v2197_v31 = vld [vmem:[%s2670_s7 + $0x334] sm:$0xf0]  ;;  %v2050_v32 = vld [vmem:[%s2670_s7 + $0x3b0] sm:$0xf]  ;;  %v1923_v35 = vor.u32 %v2181_v29, %v1922_v27  ;;  %v2163_v38 = vld [vmem:[%s2670_s7 + $0x224] sm:$0xf0] }
  0x7f   : > { %1177 = vmatpush.bf16.msrb.mxu1 %v1955_v41  ;;  %1146 = vmatmul.bf16.vlgmr.msra.gmra.mxu2 %v2772_v1  ;;  %v2213_v33 = vld [vmem:[%s2670_s7 + $0x3b4] sm:$0xf0]  ;;  %v1987_v36 = vor.u32 %v2197_v31, %v1986_v30  ;;  %v1914_v39 = vld [vmem:[%s2670_s7 + $0x2a0] sm:$0xf]  ;;  %v2179_v41 = vld [vmem:[%s2670_s7 + $0x2a4] sm:$0xf0] }
  0x80   : > { %1190 = vmatpush.bf16.msrb.mxu2 %v2019_v42  ;;  %1159 = vmatmul.bf16.vlgmr.msra.gmra.mxu3 %v2776_v6  ;;  %v2051_v40 = vor.u32 %v2213_v33, %v2050_v32  ;;  %v1978_v42 = vld [vmem:[%s2670_s7 + $0x320] sm:$0xf]  ;;  %v2195_v43 = vld [vmem:[%s2670_s7 + $0x324] sm:$0xf0]  ;;  %v1915_v47 = vor.u32 %v2179_v41, %v1914_v39  ;;  %v1842_v49 = vld [vmem:[%s2670_s7 + $0x210] sm:$0xf] }
  0x81   : > { %1203 = vmatpush.bf16.msrb.mxu3 %v2083_v46  ;;  %v2042_v44 = vld [vmem:[%s2670_s7 + $0x3a0] sm:$0xf]  ;;  %v2211_v45 = vld [vmem:[%s2670_s7 + $0x3a4] sm:$0xf0]  ;;  %v1851_v46 = vor.u32 %v2163_v38, %v1850_v37  ;;  %v1979_v48 = vor.u32 %v2195_v43, %v1978_v42  ;;  %v2161_v50 = vld [vmem:[%s2670_s7 + $0x214] sm:$0xf0] }
  0x82   : > { %1165 = vmatpush.bf16.msrb.mxu0 %v1883_v53  ;;  %v1906_v51 = vld [vmem:[%s2670_s7 + $0x290] sm:$0xf]  ;;  %v2043_v52 = vor.u32 %v2211_v45, %v2042_v44  ;;  %v2177_v53 = vld [vmem:[%s2670_s7 + $0x294] sm:$0xf0]  ;;  %v1843_v59 = vor.u32 %v2161_v50, %v1842_v49  ;;  %v2159_v60 = vld [vmem:[%s2670_s7 + $0x204] sm:$0xf0] }
  0x83   : > { %1178 = vmatpush.bf16.msrb.mxu1 %v1947_v57  ;;  %v1970_v54 = vld [vmem:[%s2670_s7 + $0x310] sm:$0xf]  ;;  %v2193_v55 = vld [vmem:[%s2670_s7 + $0x314] sm:$0xf0]  ;;  %v1898_v61 = vld [vmem:[%s2670_s7 + $0x280] sm:$0xf]  ;;  %v1907_v63 = vor.u32 %v2177_v53, %v1906_v51 }
  0x84   : > { %1191 = vmatpush.bf16.msrb.mxu2 %v2011_v58  ;;  %v2034_v56 = vld [vmem:[%s2670_s7 + $0x390] sm:$0xf]  ;;  %v2209_v57 = vld [vmem:[%s2670_s7 + $0x394] sm:$0xf0]  ;;  %v1834_v58 = vld [vmem:[%s2670_s7 + $0x200] sm:$0xf]  ;;  %v1971_v0 = vor.u32 %v2193_v55, %v1970_v54 }
  0x85   : > { %1204 = vmatpush.bf16.msrb.mxu3 %v2075_v62  ;;  %v2175_v62 = vld [vmem:[%s2670_s7 + $0x284] sm:$0xf0]  ;;  %v1962_v2 = vld [vmem:[%s2670_s7 + $0x300] sm:$0xf]  ;;  %v315_v4 = vld [vmem:[#allocation2 + $0x18] sm:$0xff]  ;;  %v2035_v5 = vor.u32 %v2209_v57, %v2034_v56  ;;  %v1835_v13 = vor.u32 %v2159_v60, %v1834_v58  ;;  %s307_s22 = scalar_lea.vmem [#allocation10], %s1575_s28 }
  0x86   : > { %1166 = vmatpush.bf16.msrb.mxu0 %v1875_v8  ;;  %v2191_v3 = vld [vmem:[%s2670_s7 + $0x304] sm:$0xf0]  ;;  %v2026_v7 = vld [vmem:[%s2670_s7 + $0x380] sm:$0xf]  ;;  %v1636_v11 = vld [vmem:[%s2670_s7 + $0x78] sm:$0xf0]  ;;  %v454_v19 = vunpack.c.l.b16 %v315_v4  ;;  %v1899_v20 = vor.u32 %v2175_v62, %v1898_v61  ;;  %v455_v25 = vunpack.c.h.b16 %v315_v4 }
  0x87   : > { %1179 = vmatpush.bf16.msrb.mxu1 %v1939_v9  ;;  %v2207_v8 = vld [vmem:[%s2670_s7 + $0x384] sm:$0xf0]  ;;  %v314_v9 = vld [vmem:[#allocation2 + $0x10] sm:$0xff]  ;;  %v1764_v18 = vld [vmem:[%s2670_s7 + $0x178] sm:$0xf0]  ;;  %v1963_v21 = vor.u32 %v2191_v3, %v1962_v2  ;;  %s1431_s20 = sshll.u32 %s307_s22, 4  ;;  %s1432_s20 = int_to_ptr.vmem [resolvable:$true] %s1431_s20 }
  0x88   : > { %1192 = vmatpush.bf16.msrb.mxu2 %v2003_v10  ;;  %v2108_v10 = vld [vmem:[%s2670_s7 + $0x74] sm:$0xf]  ;;  %v2027_v26 = vor.u32 %v2207_v8, %v2026_v7  ;;  %v2106_v31 = vld [vmem:[%s2670_s7 + $0x64] sm:$0xf]  ;;  %v1628_v32 = vld [vmem:[%s2670_s7 + $0x68] sm:$0xf0] }
  0x89   : > { %1205 = vmatpush.bf16.msrb.mxu3 %v2067_v16  ;;  %v2124_v12 = vld [vmem:[%s2670_s7 + $0xf4] sm:$0xf]  ;;  %v1700_v16 = vld [vmem:[%s2670_s7 + $0xf8] sm:$0xf0]  ;;  %v1639_v27 = vor.u32 %v2108_v10, %v1636_v11  ;;  %v2122_v33 = vld [vmem:[%s2670_s7 + $0xe4] sm:$0xf]  ;;  %v1631_v43 = vor.u32 %v2106_v31, %v1628_v32 }
  0x8a   : > { %1167 = vmatpush.bf16.msrb.mxu0 %v1867_v22  ;;  %v2140_v17 = vld [vmem:[%s2670_s7 + $0x174] sm:$0xf]  ;;  %v1703_v29 = vor.u32 %v2124_v12, %v1700_v16  ;;  %v2138_v37 = vld [vmem:[%s2670_s7 + $0x164] sm:$0xf]  ;;  %v1756_v38 = vld [vmem:[%s2670_s7 + $0x168] sm:$0xf0] }
  0x8b   : > { %1180 = vmatpush.bf16.msrb.mxu1 %v1931_v23  ;;  %v2156_v22 = vld [vmem:[%s2670_s7 + $0x1f4] sm:$0xf]  ;;  %v1828_v23 = vld [vmem:[%s2670_s7 + $0x1f8] sm:$0xf0]  ;;  %v1767_v30 = vor.u32 %v2140_v17, %v1764_v18  ;;  %v2154_v41 = vld [vmem:[%s2670_s7 + $0x1e4] sm:$0xf] }
  0x8c   : > { %1193 = vmatpush.bf16.msrb.mxu2 %v1995_v24  ;;  %v452_v24 = vunpack.c.l.b16 %v314_v9  ;;  %v1820_v42 = vld [vmem:[%s2670_s7 + $0x1e8] sm:$0xf0]  ;;  %v2120_v49 = vld [vmem:[%s2670_s7 + $0xd4] sm:$0xf]  ;;  %v1684_v51 = vld [vmem:[%s2670_s7 + $0xd8] sm:$0xf0] }
  0x8d   : > { %1206 = vmatpush.bf16.msrb.mxu3 %v2059_v28  ;;  %v453_v28 = vunpack.c.h.b16 %v314_v9  ;;  %v1823_v50 = vor.u32 %v2154_v41, %v1820_v42  ;;  %v1748_v53 = vld [vmem:[%s2670_s7 + $0x158] sm:$0xf0]  ;;  %v2152_v54 = vld [vmem:[%s2670_s7 + $0x1d4] sm:$0xf]  ;;  %v1687_v57 = vor.u32 %v2120_v49, %v1684_v51  ;;  %v1612_v60 = vld [vmem:[%s2670_s7 + $0x48] sm:$0xf0] }
  0x8e   : > { %1168 = vmatpush.bf16.msrb.mxu0 %v1859_v34  ;;  %v1831_v34 = vor.u32 %v2156_v22, %v1828_v23  ;;  %v2842_v39 = vpack.c.b16 %v452_v24, %v452_v24  ;;  %v1812_v55 = vld [vmem:[%s2670_s7 + $0x1d8] sm:$0xf0]  ;;  %v2118_v61 = vld [vmem:[%s2670_s7 + $0xc4] sm:$0xf]  ;;  %v1740_v2 = vld [vmem:[%s2670_s7 + $0x148] sm:$0xf0] }
  0x8f   : > { %1181 = vmatpush.bf16.msrb.mxu1 %v1923_v35  ;;  %v2837_v35 = vpack.c.b16 %v454_v19, %v454_v19  ;;  %v2848_v44 = vpack.c.b16 %v453_v28, %v453_v28  ;;  %v1815_v62 = vor.u32 %v2152_v54, %v1812_v55  ;;  %v2150_v3 = vld [vmem:[%s2670_s7 + $0x1c4] sm:$0xf]  ;;  %v1804_v4 = vld [vmem:[%s2670_s7 + $0x1c8] sm:$0xf0]  ;;  %v2100_v9 = vld [vmem:[%s2670_s7 + $0x34] sm:$0xf] }
  0x90   : > { %1194 = vmatpush.bf16.msrb.mxu2 %v1987_v36  ;;  %v1692_v36 = vld [vmem:[%s2670_s7 + $0xe8] sm:$0xf0]  ;;  %v1604_v10 = vld [vmem:[%s2670_s7 + $0x38] sm:$0xf0]  ;;  %v2116_v11 = vld [vmem:[%s2670_s7 + $0xb4] sm:$0xf]  ;;  %v1807_v12 = vor.u32 %v2150_v3, %v1804_v4 }
  0x91   : > { %1207 = vmatpush.bf16.msrb.mxu3 %v2051_v40  ;;  %v2844_v40 = vpack.c.b16 %v455_v25, %v455_v25  ;;  %v1695_v45 = vor.u32 %v2122_v33, %v1692_v36  ;;  %v2132_v16 = vld [vmem:[%s2670_s7 + $0x134] sm:$0xf]  ;;  %v1732_v17 = vld [vmem:[%s2670_s7 + $0x138] sm:$0xf0]  ;;  %v2098_v23 = vld [vmem:[%s2670_s7 + $0x24] sm:$0xf] }
  0x92   : > { %1169 = vmatpush.bf16.msrb.mxu0 %v1851_v46  ;;  %v1759_v46 = vor.u32 %v2138_v37, %v1756_v38  ;;  %v2148_v18 = vld [vmem:[%s2670_s7 + $0x1b4] sm:$0xf]  ;;  %v1796_v19 = vld [vmem:[%s2670_s7 + $0x1b8] sm:$0xf0]  ;;  %v1735_v22 = vor.u32 %v2132_v16, %v1732_v17  ;;  %v1596_v24 = vld [vmem:[%s2670_s7 + $0x28] sm:$0xf0] }
  0x93   : > { %1182 = vmatpush.bf16.msrb.mxu1 %v1915_v47  ;;  %v2104_v47 = vld [vmem:[%s2670_s7 + $0x54] sm:$0xf]  ;;  %v2114_v25 = vld [vmem:[%s2670_s7 + $0xa4] sm:$0xf]  ;;  %v1788_v31 = vld [vmem:[%s2670_s7 + $0x1a8] sm:$0xf0]  ;;  %v1599_v32 = vor.u32 %v2098_v23, %v1596_v24 }
  0x94   : > { %1195 = vmatpush.bf16.msrb.mxu2 %v1979_v48  ;;  %v1620_v48 = vld [vmem:[%s2670_s7 + $0x58] sm:$0xf0]  ;;  %v2130_v28 = vld [vmem:[%s2670_s7 + $0x124] sm:$0xf]  ;;  %v2096_v36 = vld [vmem:[%s2670_s7 + $0x14] sm:$0xf] }
  0x95   : > { %1208 = vmatpush.bf16.msrb.mxu3 %v2043_v52  ;;  %v2136_v52 = vld [vmem:[%s2670_s7 + $0x154] sm:$0xf]  ;;  %v1623_v56 = vor.u32 %v2104_v47, %v1620_v48  ;;  %v1588_v37 = vld [vmem:[%s2670_s7 + $0x18] sm:$0xf0]  ;;  %v2094_v49 = vld [vmem:[%s2670_s7 + $0x4] sm:$0xf] }
  0x96   : > { %1170 = vmatpush.bf16.msrb.mxu0 %v1843_v59  ;;  %v1751_v58 = vor.u32 %v2136_v52, %v1748_v53  ;;  %v2102_v59 = vld [vmem:[%s2670_s7 + $0x44] sm:$0xf]  ;;  %v2112_v38 = vld [vmem:[%s2670_s7 + $0x94] sm:$0xf]  ;;  %v1652_v42 = vld [vmem:[%s2670_s7 + $0x98] sm:$0xf0]  ;;  %v1591_v48 = vor.u32 %v2096_v36, %v1588_v37 }
  0x97   : > { %1183 = vmatpush.bf16.msrb.mxu1 %v1907_v63  ;;  %v1676_v63 = vld [vmem:[%s2670_s7 + $0xc8] sm:$0xf0]  ;;  %v1780_v47 = vld [vmem:[%s2670_s7 + $0x198] sm:$0xf0]  ;;  %v1655_v51 = vor.u32 %v2112_v38, %v1652_v42  ;;  %v2110_v53 = vld [vmem:[%s2670_s7 + $0x84] sm:$0xf] }
  0x98   : > { %1196 = vmatpush.bf16.msrb.mxu2 %v1971_v0  ;;  %v2134_v0 = vld [vmem:[%s2670_s7 + $0x144] sm:$0xf]  ;;  %v1679_v7 = vor.u32 %v2118_v61, %v1676_v63  ;;  %v1644_v54 = vld [vmem:[%s2670_s7 + $0x88] sm:$0xf0]  ;;  %v1892_v61 = vld [vmem:[%s2670_s7 + $0x278] sm:$0xf0] }
  0x99   : > { %1209 = vmatpush.bf16.msrb.mxu3 %v2035_v5  ;;  %v1615_v5 = vor.u32 %v2102_v59, %v1612_v60  ;;  %v1743_v8 = vor.u32 %v2134_v0, %v1740_v2  ;;  %v2126_v55 = vld [vmem:[%s2670_s7 + $0x104] sm:$0xf]  ;;  %v1772_v59 = vld [vmem:[%s2670_s7 + $0x188] sm:$0xf0]  ;;  %v2172_v60 = vld [vmem:[%s2670_s7 + $0x274] sm:$0xf]  ;;  %v1647_v4 = vor.u32 %v2110_v53, %v1644_v54 }
  0x9a   : > { %1171 = vmatpush.bf16.msrb.mxu0 %v1835_v13  ;;  %v1668_v13 = vld [vmem:[%s2670_s7 + $0xb8] sm:$0xf0]  ;;  %v2204_v2 = vld [vmem:[%s2670_s7 + $0x374] sm:$0xf]  ;;  %v1884_v16 = vld [vmem:[%s2670_s7 + $0x268] sm:$0xf0] }
  0x9b   : > { %1184 = vmatpush.bf16.msrb.mxu1 %v1899_v20  ;;  %v1607_v20 = vor.u32 %v2100_v9, %v1604_v10  ;;  %v1956_v0 = vld [vmem:[%s2670_s7 + $0x2f8] sm:$0xf0]  ;;  %v1895_v10 = vor.u32 %v2172_v60, %v1892_v61  ;;  %v2186_v17 = vld [vmem:[%s2670_s7 + $0x2e4] sm:$0xf]  ;;  %v2076_v23 = vld [vmem:[%s2670_s7 + $0x3e8] sm:$0xf0] }
  0x9c   : > { %1197 = vmatpush.bf16.msrb.mxu2 %v1963_v21  ;;  %v1671_v21 = vor.u32 %v2116_v11, %v1668_v13  ;;  %v2020_v3 = vld [vmem:[%s2670_s7 + $0x378] sm:$0xf0]  ;;  %v2170_v13 = vld [vmem:[%s2670_s7 + $0x264] sm:$0xf]  ;;  %v1868_v42 = vld [vmem:[%s2670_s7 + $0x248] sm:$0xf0] }
  0x9d   : > { %1210 = vmatpush.bf16.msrb.mxu3 %v2027_v26  ;;  %1172 = vmatmul.bf16.vlgmr.msrb.gmra.mxu0 %v2842_v39  ;;  %v1799_v26 = vor.u32 %v2148_v18, %v1796_v19  ;;  %v1948_v19 = vld [vmem:[%s2670_s7 + $0x2e8] sm:$0xf0]  ;;  %v1887_v24 = vor.u32 %v2170_v13, %v1884_v16  ;;  %v2068_v36 = vld [vmem:[%s2670_s7 + $0x3d8] sm:$0xf0]  ;;  %v2180_v53 = vld [vmem:[%s2670_s7 + $0x2b4] sm:$0xf] }
  0x9e   : > { %1216 = vmatpush.bf16.msra.mxu0 %v1639_v27  ;;  %1185 = vmatmul.bf16.vlgmr.msrb.gmra.mxu1 %v2848_v44  ;;  %v1660_v27 = vld [vmem:[%s2670_s7 + $0xa8] sm:$0xf0]  ;;  %v2160_v13 = vld [vmem:[%s2670_s7 + $0x214] sm:$0xf]  ;;  %v1844_v16 = vld [vmem:[%s2670_s7 + $0x218] sm:$0xf0] }
  0x9f   : > { %1229 = vmatpush.bf16.msra.mxu1 %v1703_v29  ;;  %1198 = vmatmul.bf16.vlgmr.msrb.gmra.mxu2 %v2837_v35  ;;  %v1724_v29 = vld [vmem:[%s2670_s7 + $0x128] sm:$0xf0]  ;;  %v1663_v33 = vor.u32 %v2114_v25, %v1660_v27  ;;  %v1951_v25 = vor.u32 %v2186_v17, %v1948_v19  ;;  %v2168_v27 = vld [vmem:[%s2670_s7 + $0x254] sm:$0xf]  ;;  %v1908_v19 = vld [vmem:[%s2670_s7 + $0x298] sm:$0xf0] }
  0xa0   : > { %1242 = vmatpush.bf16.msra.mxu2 %v1767_v30  ;;  %1211 = vmatmul.bf16.vlgmr.msrb.gmra.mxu3 %v2844_v40  ;;  %v2146_v30 = vld [vmem:[%s2670_s7 + $0x1a4] sm:$0xf]  ;;  %v2176_v17 = vld [vmem:[%s2670_s7 + $0x294] sm:$0xf]  ;;  %s1433_s8 = sshll.u32 %s1429_s0, 4  ;;  %s1418_s26 = scalar_lea.sflag [#allocation4], %s2667_s11  ;;  %s1434_s8 = int_to_ptr.hbm [resolvable:$true] %s1433_s8 }
  0xa1   : > { %1255 = vmatpush.bf16.msra.mxu3 %v1831_v34  ;;  %v1727_v34 = vor.u32 %v2130_v28, %v1724_v29  ;;  %v1791_v41 = vor.u32 %v2146_v30, %v1788_v31  ;;  %v1876_v28 = vld [vmem:[%s2670_s7 + $0x258] sm:$0xf0]  ;;  %v2184_v29 = vld [vmem:[%s2670_s7 + $0x2d4] sm:$0xf]  ;;  %s2431_s27 = sshra.s32 %s1434_s8, 4  ;;  %s2437_s21 = scalar_lea.hbm %s3032_s4, 32  ;;  %s2432_s27 = int_to_ptr.hbm [resolvable:$true] %s2431_s27 }
  0xa2   : > { %1217 = vmatpush.bf16.msra.mxu0 %v1631_v43  ;;  %v2128_v43 = vld [vmem:[%s2670_s7 + $0x114] sm:$0xf]  ;;  %v1940_v31 = vld [vmem:[%s2670_s7 + $0x2d8] sm:$0xf0]  ;;  %v1879_v37 = vor.u32 %v2168_v27, %v1876_v28  ;;  %v2158_v27 = vld [vmem:[%s2670_s7 + $0x204] sm:$0xf]  ;;  %p2438_p8 = scmp.lt.s32.totalorder %s2432_s27, %s3032_s4 }
  0xa3   : > { %1230 = vmatpush.bf16.msra.mxu1 %v1695_v45  ;;  %v1716_v45 = vld [vmem:[%s2670_s7 + $0x118] sm:$0xf0]  ;;  %v1836_v28 = vld [vmem:[%s2670_s7 + $0x208] sm:$0xf0]  ;;  %s2433_s5 = scalar_lea.hbm %s2432_s27, 8 }
  0xa4   : > { %1243 = vmatpush.bf16.msra.mxu2 %v1759_v46  ;;  %v2144_v46 = vld [vmem:[%s2670_s7 + $0x194] sm:$0xf]  ;;  %v1719_v52 = vor.u32 %v2128_v43, %v1716_v45  ;;  %v2182_v43 = vld [vmem:[%s2670_s7 + $0x2c4] sm:$0xf]  ;;  %v1932_v45 = vld [vmem:[%s2670_s7 + $0x2c8] sm:$0xf0]  ;;  %p2434_p5 = scmp.ne.s32.totalorder %s2432_s27, %s2433_s5  ;;  %p2439_p12 = scmp.lt.s32.totalorder %s2437_s21, %s2433_s5 }
  0xa5   : > { %1256 = vmatpush.bf16.msra.mxu3 %v1823_v50  ;;  %v1580_v50 = vld [vmem:[%s2670_s7 + $0x8] sm:$0xf0] }
  0xa6   : > { %1218 = vmatpush.bf16.msra.mxu0 %v1623_v56  ;;  %v1783_v56 = vor.u32 %v2144_v46, %v1780_v47  ;;  %v1583_v63 = vor.u32 %v2094_v49, %v1580_v50  ;;  %v1996_v46 = vld [vmem:[%s2670_s7 + $0x348] sm:$0xf0]  ;;  %v2214_v47 = vld [vmem:[%s2670_s7 + $0x3c4] sm:$0xf]  ;;  %v1935_v49 = vor.u32 %v2182_v43, %v1932_v45  ;;  %p2435_p7 = pnand %p2434_p5, %p2607_p9  ;;  %p2440_p1 = por %p2439_p12, %p2438_p8 }
  0xa7   : > { %1231 = vmatpush.bf16.msra.mxu1 %v1687_v57  ;;  %v1708_v57 = vld [vmem:[%s2670_s7 + $0x108] sm:$0xf0] }
  0xa8   : > { %1244 = vmatpush.bf16.msra.mxu2 %v1751_v58  ;;  %v2142_v58 = vld [vmem:[%s2670_s7 + $0x184] sm:$0xf]  ;;  %p2436_p2 = pneg %p2435_p7 }
  0xa9   : > { %1257 = vmatpush.bf16.msra.mxu3 %v1815_v62  ;;  %v2188_v62 = vld [vmem:[%s2670_s7 + $0x2f4] sm:$0xf]  ;;  %v1775_v9 = vor.u32 %v2142_v58, %v1772_v59  ;;  %v2052_v59 = vld [vmem:[%s2670_s7 + $0x3b8] sm:$0xf0] }
  0xaa   : > { %1219 = vmatpush.bf16.msra.mxu0 %v1615_v5  ;;  %v1711_v5 = vor.u32 %v2126_v55, %v1708_v57  ;;  %v1959_v11 = vor.u32 %v2188_v62, %v1956_v0  ;;  %v1924_v55 = vld [vmem:[%s2670_s7 + $0x2b8] sm:$0xf0]  ;;  %v2212_v58 = vld [vmem:[%s2670_s7 + $0x3b4] sm:$0xf]  ;;  %v1852_v0 = vld [vmem:[%s2670_s7 + $0x228] sm:$0xf0]  ;;  %p2441_p3 = pnand %p2440_p1, %p2436_p2 }
  0xab   : > { %1232 = vmatpush.bf16.msra.mxu1 %v1679_v7  ;;  %v2220_v7 = vld [vmem:[%s2670_s7 + $0x3f4] sm:$0xf]  ;;  %v1988_v57 = vld [vmem:[%s2670_s7 + $0x338] sm:$0xf0]  ;;  %v1927_v61 = vor.u32 %v2180_v53, %v1924_v55 }
  0xac   : > { %1245 = vmatpush.bf16.msra.mxu2 %v1743_v8  ;;  %v2084_v8 = vld [vmem:[%s2670_s7 + $0x3f8] sm:$0xf0] }
  0xad   : > { %1258 = vmatpush.bf16.msra.mxu3 %v1807_v12  ;;  %v2023_v12 = vor.u32 %v2204_v2, %v2020_v3  ;;  %v2087_v18 = vor.u32 %v2220_v7, %v2084_v8  ;;  %v2178_v2 = vld [vmem:[%s2670_s7 + $0x2a4] sm:$0xf]  ;;  %v2055_v3 = vor.u32 %v2212_v58, %v2052_v59  ;;  %v1980_v7 = vld [vmem:[%s2670_s7 + $0x328] sm:$0xf0] }
  0xae   : > { %1220 = vmatpush.bf16.msra.mxu0 %v1607_v20  ;;  %v2202_v20 = vld [vmem:[%s2670_s7 + $0x364] sm:$0xf] }
  0xaf   : > { %1233 = vmatpush.bf16.msra.mxu1 %v1671_v21  ;;  %v2012_v21 = vld [vmem:[%s2670_s7 + $0x368] sm:$0xf0]  ;;  %v2210_v8 = vld [vmem:[%s2670_s7 + $0x3a4] sm:$0xf] }
  0xb0   : > { %1246 = vmatpush.bf16.msra.mxu2 %v1735_v22  ;;  %v2218_v22 = vld [vmem:[%s2670_s7 + $0x3e4] sm:$0xf] }
  0xb1   : > { %1259 = vmatpush.bf16.msra.mxu3 %v1799_v26  ;;  %v2015_v26 = vor.u32 %v2202_v20, %v2012_v21  ;;  %v2079_v30 = vor.u32 %v2218_v22, %v2076_v23  ;;  %v2192_v20 = vld [vmem:[%s2670_s7 + $0x314] sm:$0xf]  ;;  %v1972_v21 = vld [vmem:[%s2670_s7 + $0x318] sm:$0xf0] }
  0xb2   : > { %1221 = vmatpush.bf16.msra.mxu0 %v1599_v32  ;;  %v2200_v32 = vld [vmem:[%s2670_s7 + $0x354] sm:$0xf]  ;;  %v2036_v23 = vld [vmem:[%s2670_s7 + $0x398] sm:$0xf0] }
  0xb3   : > { %1234 = vmatpush.bf16.msra.mxu1 %v1663_v33  ;;  %v2004_v33 = vld [vmem:[%s2670_s7 + $0x358] sm:$0xf0]  ;;  %v2208_v22 = vld [vmem:[%s2670_s7 + $0x394] sm:$0xf] }
  0xb4   : > { %1247 = vmatpush.bf16.msra.mxu2 %v1727_v34  ;;  %v2216_v34 = vld [vmem:[%s2670_s7 + $0x3d4] sm:$0xf]  ;;  %v2007_v38 = vor.u32 %v2200_v32, %v2004_v33  ;;  %v2190_v32 = vld [vmem:[%s2670_s7 + $0x304] sm:$0xf]  ;;  %v1964_v33 = vld [vmem:[%s2670_s7 + $0x308] sm:$0xf0] }
  0xb5   : > { %1260 = vmatpush.bf16.msra.mxu3 %v1791_v41  ;;  %v2166_v41 = vld [vmem:[%s2670_s7 + $0x244] sm:$0xf] }
  0xb6   : > { %1222 = vmatpush.bf16.msra.mxu0 %v1591_v48  ;;  %v1871_v48 = vor.u32 %v2166_v41, %v1868_v42 }
  0xb7   : > { %1235 = vmatpush.bf16.msra.mxu1 %v1655_v51  ;;  %v2164_v51 = vld [vmem:[%s2670_s7 + $0x234] sm:$0xf] }
  0xb8   : > { %1248 = vmatpush.bf16.msra.mxu2 %v1719_v52  ;;  %v1860_v52 = vld [vmem:[%s2670_s7 + $0x238] sm:$0xf0] }
  0xb9   : > { %1261 = vmatpush.bf16.msra.mxu3 %v1783_v56  ;;  %v2196_v56 = vld [vmem:[%s2670_s7 + $0x334] sm:$0xf]  ;;  %v1863_v60 = vor.u32 %v2164_v51, %v1860_v52 }
  0xba   : > { %1223 = vmatpush.bf16.msra.mxu0 %v1583_v63  ;;  %v1991_v62 = vor.u32 %v2196_v56, %v1988_v57  ;;  %v2162_v63 = vld [vmem:[%s2670_s7 + $0x224] sm:$0xf] }
  0xbb   : > { %1236 = vmatpush.bf16.msra.mxu1 %v1647_v4  ;;  %v1916_v4 = vld [vmem:[%s2670_s7 + $0x2a8] sm:$0xf0] }
  0xbc   : > { %1249 = vmatpush.bf16.msra.mxu2 %v1711_v5  ;;  %v2194_v5 = vld [vmem:[%s2670_s7 + $0x324] sm:$0xf] }
  0xbd   : > { %1262 = vmatpush.bf16.msra.mxu3 %v1775_v9  ;;  %1224 = vmatmul.bf16.vlgmr.msra.gmra.mxu0 %v2782_v14  ;;  %v2071_v14 = vor.u32 %v2216_v34, %v2068_v36  ;;  %v2044_v9 = vld [vmem:[%s2670_s7 + $0x3a8] sm:$0xf0]  ;;  %v2206_v34 = vld [vmem:[%s2670_s7 + $0x384] sm:$0xf] }
  0xbe   : > { %1268 = vmatpush.bf16.msrb.mxu0 %v1895_v10  ;;  %1237 = vmatmul.bf16.vlgmr.msra.gmra.mxu1 %v2784_v15  ;;  %v2060_v15 = vld [vmem:[%s2670_s7 + $0x3c8] sm:$0xf0]  ;;  %v1855_v10 = vor.u32 %v2162_v63, %v1852_v0 }
  0xbf   : > { %1281 = vmatpush.bf16.msrb.mxu1 %v1959_v11  ;;  %1250 = vmatmul.bf16.vlgmr.msra.gmra.mxu2 %v2772_v1  ;;  %v1943_v1 = vor.u32 %v2184_v29, %v1940_v31  ;;  %v2063_v54 = vor.u32 %v2214_v47, %v2060_v15  ;;  %v1919_v11 = vor.u32 %v2178_v2, %v1916_v4  ;;  %v2174_v29 = vld [vmem:[%s2670_s7 + $0x284] sm:$0xf]  ;;  %v1900_v31 = vld [vmem:[%s2670_s7 + $0x288] sm:$0xf0] }
  0xc0   : > { %1294 = vmatpush.bf16.msrb.mxu2 %v2023_v12  ;;  %1263 = vmatmul.bf16.vlgmr.msra.gmra.mxu3 %v2776_v6  ;;  %v2198_v6 = vld [vmem:[%s2670_s7 + $0x344] sm:$0xf]  ;;  %v1983_v12 = vor.u32 %v2194_v5, %v1980_v7  ;;  %v2028_v36 = vld [vmem:[%s2670_s7 + $0x388] sm:$0xf0] }
  0xc1   : > { %1307 = vmatpush.bf16.msrb.mxu3 %v2087_v18  ;;  %v1999_v50 = vor.u32 %v2198_v6, %v1996_v46  ;;  %v2047_v18 = vor.u32 %v2210_v8, %v2044_v9  ;;  %v2031_v41 = vor.u32 %v2206_v34, %v2028_v36 }
  0xc2   : > { %1269 = vmatpush.bf16.msrb.mxu0 %v1887_v24  ;;  %v1847_v24 = vor.u32 %v2160_v13, %v1844_v16 }
  0xc3   : > { %1282 = vmatpush.bf16.msrb.mxu1 %v1951_v25  ;;  %v1911_v25 = vor.u32 %v2176_v17, %v1908_v19 }
  0xc4   : > { %1295 = vmatpush.bf16.msrb.mxu2 %v2015_v26  ;;  %v1975_v26 = vor.u32 %v2192_v20, %v1972_v21 }
  0xc5   : > { %1308 = vmatpush.bf16.msrb.mxu3 %v2079_v30  ;;  %v2039_v30 = vor.u32 %v2208_v22, %v2036_v23 }
  0xc6   : > { %1270 = vmatpush.bf16.msrb.mxu0 %v1879_v37  ;;  %v1839_v37 = vor.u32 %v2158_v27, %v1836_v28 }
  0xc7   : > { %1283 = vmatpush.bf16.msrb.mxu1 %v1943_v1  ;;  %v1903_v1 = vor.u32 %v2174_v29, %v1900_v31 }
  0xc8   : > { %1296 = vmatpush.bf16.msrb.mxu2 %v2007_v38  ;;  %v1967_v38 = vor.u32 %v2190_v32, %v1964_v33 }
  0xc9   : > { %1309 = vmatpush.bf16.msrb.mxu3 %v2071_v14 }
  0xca   : > { %1271 = vmatpush.bf16.msrb.mxu0 %v1871_v48 }
  0xcb   : > { %1284 = vmatpush.bf16.msrb.mxu1 %v1935_v49 }
  0xcc   : > { %1297 = vmatpush.bf16.msrb.mxu2 %v1999_v50 }
  0xcd   : > { %1310 = vmatpush.bf16.msrb.mxu3 %v2063_v54 }
  0xce   : > { %1272 = vmatpush.bf16.msrb.mxu0 %v1863_v60 }
  0xcf   : > { %1285 = vmatpush.bf16.msrb.mxu1 %v1927_v61 }
  0xd0   : > { %1298 = vmatpush.bf16.msrb.mxu2 %v1991_v62 }
  0xd1   : > { %1311 = vmatpush.bf16.msrb.mxu3 %v2055_v3 }
  0xd2   : > { %1273 = vmatpush.bf16.msrb.mxu0 %v1855_v10 }
  0xd3   : > { %1286 = vmatpush.bf16.msrb.mxu1 %v1919_v11 }
  0xd4   : > { %1299 = vmatpush.bf16.msrb.mxu2 %v1983_v12 }
  0xd5   : > { %1312 = vmatpush.bf16.msrb.mxu3 %v2047_v18 }
  0xd6   : > { %1274 = vmatpush.bf16.msrb.mxu0 %v1847_v24 }
  0xd7   : > { %1287 = vmatpush.bf16.msrb.mxu1 %v1911_v25 }
  0xd8   : > { %1300 = vmatpush.bf16.msrb.mxu2 %v1975_v26 }
  0xd9   : > { %1313 = vmatpush.bf16.msrb.mxu3 %v2039_v30 }
  0xda   : > { %1275 = vmatpush.bf16.msrb.mxu0 %v1839_v37 }
  0xdb   : > { %1288 = vmatpush.bf16.msrb.mxu1 %v1903_v1 }
  0xdc   : > { %1301 = vmatpush.bf16.msrb.mxu2 %v1967_v38 }
  0xdd   : > { %1314 = vmatpush.bf16.msrb.mxu3 %v2031_v41  ;;  %1276 = vmatmul.bf16.vlgmr.msrb.gmra.mxu0 %v2842_v39 }
  0xde   : > { %1289 = vmatmul.bf16.vlgmr.msrb.gmra.mxu1 %v2848_v44 }
  0xdf   : > { %1302 = vmatmul.bf16.vlgmr.msrb.gmra.mxu2 %v2837_v35 }
  0xe0   : > { %1315 = vmatmul.bf16.vlgmr.msrb.gmra.mxu3 %v2844_v40 }
  0xfa   : > { %v1121_v42 = vpop.f32.mrf.mxu0 }
  0xfb   : > { %v1134_v43 = vpop.f32.mrf.mxu1 }
  0xfc   : > { %v1135_v14 = vadd.f32 %v1134_v43, %v1121_v42 }
 0x102   : > { %v1147_v45 = vpop.f32.mrf.mxu2  ;;  %v1123_v15 = vpop.f32.mrf.mxu0 }
 0x103   : > { %v1148_v6 = vadd.f32 %v1147_v45, %v1135_v14  ;;  %v1160_v46 = vpop.f32.mrf.mxu3  ;;  %v1136_v48 = vpop.f32.mrf.mxu1 }
 0x105   : > { %v1161_v47 = vadd.f32 %v1160_v46, %v1148_v6 }
 0x10a   : > { %v1149_v49 = vpop.f32.mrf.mxu2 }
 0x10b   : > { %v1162_v50 = vpop.f32.mrf.mxu3 }
 0x11a   : > { %v1173_v51 = vpop.f32.mrf.mxu0 }
 0x11b   : > { %v1174_v52 = vadd.f32 %v1173_v51, %v1161_v47  ;;  %v1186_v39 = vpop.f32.mrf.mxu1 }
 0x11d   : > { %v1187_v53 = vadd.f32 %v1186_v39, %v1174_v52 }
 0x122   : > { %v1199_v44 = vpop.f32.mrf.mxu2  ;;  %v1175_v35 = vpop.f32.mrf.mxu0 }
 0x123   : > { %v1212_v54 = vpop.f32.mrf.mxu3  ;;  %v1188_v55 = vpop.f32.mrf.mxu1  ;;  %v1200_v57 = vadd.f32 %v1199_v44, %v1187_v53 }
 0x125   : > { %v2974_v60 = vadd.f32 %v1212_v54, %v1200_v57 }
 0x127   : > { %v1320_v63 = vrot.slane %v2974_v60, 4  ;;  %v1332_v0 = vmul.f32 %v2974_v60, %v2974_v60 }
 0x129   : > { %v1321_v4 = vadd.f32 %v1320_v63, %v2974_v60  ;;  %v1334_v5 = vrot.slane %v1332_v0, 4 }
 0x12a   : > { %v1201_v40 = vpop.f32.mrf.mxu2 }
 0x12b   : > { %v1214_v56 = vpop.f32.mrf.mxu3  ;;  %v1322_v9 = vrot.slane %v1321_v4, 2  ;;  %v1335_v10 = vadd.f32 %v1334_v5, %v1332_v0 }
 0x12d   : > { %v1323_v11 = vadd.f32 %v1322_v9, %v1321_v4  ;;  %v1336_v12 = vrot.slane %v1335_v10, 2 }
 0x12f   : > { %v1324_v16 = vrot.slane %v1323_v11, 1  ;;  %v1337_v17 = vadd.f32 %v1336_v12, %v1335_v10 }
 0x131   : > { %v1325_v19 = vadd.f32 %v1324_v16, %v1323_v11  ;;  %v1338_v20 = vrot.slane %v1337_v17, 1 }
 0x133   : > { %v1339_v25 = vadd.f32 %v1338_v20, %v1337_v17  ;;  %v2980_v26 = vmul.f32 0.125, %v1325_v19 }
 0x135   : > { %v1348_v29 = vmul.f32 0.125, %v1339_v25  ;;  %v1350_v30 = vmul.f32 %v2980_v26, %v2980_v26 }
 0x137   : > { %v1352_v37 = vsub.f32 %v1348_v29, %v1350_v30 }
 0x139   : > { %v1354_v14 = vmax.f32 %v1352_v37, 0.0 }
 0x13a   : > { %v1225_v58 = vpop.f32.mrf.mxu0 }
 0x13b   : > { %v1238_v59 = vpop.f32.mrf.mxu1  ;;  %v1357_v48 = vadd.f32 1e-05, %v1354_v14 }
 0x13c   : > { %v1239_v13 = vadd.f32 %v1238_v59, %v1225_v58 }
 0x13d   : > { %2293 = vrsqrt.f32 %v1357_v48  ;;  %vm1365_vm4 = vweird.f32 %v1357_v48 }
 0x142   : > { %v1251_v61 = vpop.f32.mrf.mxu2  ;;  %v1227_v2 = vpop.f32.mrf.mxu0 }
 0x143   : > { %v1264_v62 = vpop.f32.mrf.mxu3  ;;  %v1240_v3 = vpop.f32.mrf.mxu1  ;;  %v1252_v18 = vadd.f32 %v1251_v61, %v1239_v13 }
 0x144   : > { %v2294_v55 = vpop.eup %2293 }
 0x145   : > { %v1265_v21 = vadd.f32 %v1264_v62, %v1252_v18  ;;  %v1360_v57 = vmul.f32 %v2294_v55, %v1357_v48  ;;  %vm1366_vm1 = vweird.f32 %v2294_v55  ;;  %v1386_v18 = vld [vmem:[%s2680_s1] sm:$0x3] }
 0x146   : > { %vm1367_vm6 = vmor %vm1365_vm4, %vm1366_vm1 }
 0x147   : > { %v1361_v58 = vmul.f32 %v2294_v55, %v1360_v57 }
 0x149   : > { %v1362_v61 = vmul.f32 0.5, %v1361_v58 }
 0x14a   : > { %v1253_v7 = vpop.f32.mrf.mxu2 }
 0x14b   : > { %v1266_v8 = vpop.f32.mrf.mxu3  ;;  %v1363_v0 = vsub.f32 1.5, %v1362_v61 }
 0x14c   : > { %v1356_v8 = vld [vmem:[%s2677_s13] sm:$0x3] }
 0x14d   : > { %v1364_v4 = vmul.f32 %v2294_v55, %v1363_v0 }
 0x14f   : > { %v1368_v10 = vsel %vm1367_vm6, %v2294_v55, %v1364_v4 }
 0x15a   : > { %v1277_v22 = vpop.f32.mrf.mxu0 }
 0x15b   : > { %v1290_v23 = vpop.f32.mrf.mxu1  ;;  %v1278_v24 = vadd.f32 %v1277_v22, %v1265_v21 }
 0x15d   : > { %v1291_v27 = vadd.f32 %v1290_v23, %v1278_v24 }
 0x162   : > { %v1303_v28 = vpop.f32.mrf.mxu2  ;;  %v1279_v33 = vpop.f32.mrf.mxu0 }
 0x163   : > { %v1304_v31 = vadd.f32 %v1303_v28, %v1291_v27  ;;  %v1316_v32 = vpop.f32.mrf.mxu3  ;;  %v1292_v34 = vpop.f32.mrf.mxu1 }
 0x165   : > { %v2984_v36 = vadd.f32 %v1316_v32, %v1304_v31 }
 0x167   : > { %v1326_v1 = vrot.slane %v2984_v36, 4  ;;  %v1333_v38 = vmul.f32 %v2984_v36, %v2984_v36 }
 0x169   : > { %v1327_v41 = vadd.f32 %v1326_v1, %v2984_v36  ;;  %v1340_v42 = vrot.slane %v1333_v38, 4 }
 0x16a   : > { %v1305_v43 = vpop.f32.mrf.mxu2 }
 0x16b   : > { %v1328_v45 = vrot.slane %v1327_v41, 2  ;;  %v1341_v6 = vadd.f32 %v1340_v42, %v1333_v38  ;;  %v1318_v46 = vpop.f32.mrf.mxu3 }
 0x16d   : > { %v1329_v47 = vadd.f32 %v1328_v45, %v1327_v41  ;;  %v1342_v15 = vrot.slane %v1341_v6, 2 }
 0x16f   : > { %v1330_v49 = vrot.slane %v1329_v47, 1  ;;  %v1343_v50 = vadd.f32 %v1342_v15, %v1341_v6 }
 0x171   : > { %v1331_v51 = vadd.f32 %v1330_v49, %v1329_v47  ;;  %v1344_v52 = vrot.slane %v1343_v50, 1 }
 0x173   : > { %v1345_v39 = vadd.f32 %v1344_v52, %v1343_v50  ;;  %v1347_v53 = vmul.f32 0.125, %v1331_v51 }
 0x175   : > { %v1349_v44 = vmul.f32 0.125, %v1345_v39  ;;  %v1351_v54 = vmul.f32 %v1347_v53, %v1347_v53 }
 0x177   : > { %v1353_v35 = vsub.f32 %v1349_v44, %v1351_v54 }
 0x179   : > { %v1355_v40 = vmax.f32 %v1353_v35, 0.0 }
 0x17b   : > { %v1358_v56 = vadd.f32 1e-05, %v1355_v40 }
 0x17d   : > { %2295 = vrsqrt.f32 %v1358_v56  ;;  %vm1375_vm2 = vweird.f32 %v1358_v56 }
 0x183   : > { %v2296_v59 = vpop.eup %2295 }
 0x184   : > { %v1370_v62 = vmul.f32 %v2296_v59, %v1358_v56  ;;  %vm1376_vm0 = vweird.f32 %v2296_v59 }
 0x185   : > { %vm1377_vm3 = vmor %vm1375_vm2, %vm1376_vm0 }
 0x186   : > { %v1371_v63 = vmul.f32 %v2296_v59, %v1370_v62 }
 0x188   : > { %v1372_v2 = vmul.f32 0.5, %v1371_v63 }
 0x18a   : > { %v1373_v3 = vsub.f32 1.5, %v1372_v2 }
 0x18c   : > { %v1374_v5 = vmul.f32 %v2296_v59, %v1373_v3 }
 0x18e   : > { %v1378_v7 = vsel %vm1377_vm3, %v2296_v59, %v1374_v5 }
 0x18f   : > { %v1381_v9 = vrot.slane %v1378_v7, 7 }
 0x191   : > { %v1383_v11 = vsel %vm1382_vm5, %v1368_v10, %v1381_v9 }
 0x192   : > { %v1385_v12 = vmul.f32 %v1383_v11, %v1356_v8 }
 0x194   : > { %v1388_v13 = vperm.slane %v1385_v12, 0  ;;  %v1389_v16 = vperm.slane %v1385_v12, 1 }
 0x196   : > { %v1393_v17 = vmul.f32 %v1389_v16, %v1347_v53  ;;  %v1392_v19 = vmul.f32 %v1388_v13, %v2980_v26  ;;  %v1400_v23 = vmul.f32 %v1388_v13, %v2974_v60  ;;  %v1401_v24 = vmul.f32 %v1389_v16, %v2984_v36 }
 0x198   : > { %v1396_v20 = vrot.slane %v1393_v17, 7 }
 0x19a   : > { %v1397_v21 = vsel %vm1382_vm5, %v1392_v19, %v1396_v20 }
 0x19b   : > { %v1399_v22 = vsub.f32 %v1386_v18, %v1397_v21 }
 0x19d   : > { %v1403_v25 = vperm.slane %v1399_v22, 0  ;;  %v1404_v27 = vperm.slane %v1399_v22, 1 }
 0x19f   : > { %v1408_v28 = vadd.f32 %v1404_v27, %v1401_v24  ;;  %v1407_v29 = vadd.f32 %v1403_v25, %v1400_v23 }
 0x1a1   : > { %v1412_v26 = vmul.f32 0.2, %v1408_v28  ;;  %vm1409_vm7 = vcmp.gt.f32.partialorder %v1407_v29, 0.0  ;;  %vm1410_vm8 = vcmp.gt.f32.partialorder %v1408_v28, 0.0  ;;  %v1411_v30 = vmul.f32 0.2, %v1407_v29 }
 0x1a3   : > { %v1413_v60 = vsel %vm1409_vm7, %v1407_v29, %v1411_v30  ;;  %v1414_v31 = vsel %vm1410_vm8, %v1408_v28, %v1412_v26 }
 0x1a4   : > { %v1415_v32 = vpack.c.bf16 %v1414_v31, %v1413_v60 }
 0x1a6   : > { %1416 = vst [vmem:[%s307_s22] sm:$0xff] %v1415_v32 }
 0x1a7   : > { %2444 = shalt.err (!%p2441_p3)
}
 0x1a8   : > { %2233 = dma.vmem_to_hbm [thread:$0]  (%p2607_p9), %s1432_s20, 128, %s1434_s8, %s1418_s26  }
 0x1a9 PF: > { %p2256_p4 = scmp.ge.s32.totalorder %s2491_s18, 2  ;;  %s1445_s11 = sand.u32 1, %s2479_s15  }
 0x1aa   : > { %s1446_s10 = scalar_lea.sflag [#allocation4], %s1445_s11 }
 0x1ab   : > { %p2250_p6 = pnand %p2256_p4, %p2611_p10 }
 0x1ad   : > { %p2251_p11 = pneg %p2250_p6 }
 0x1af   : > { %2474 = dma.done.wait (%p2251_p11), %s1446_s10, 128  }
 0x1b0   : > { %2476 = vsyncadd (%p2251_p11), %s1446_s10, 4294967168  ;;  %s3043_s13 = sld [smem:[#allocation15_spill]]  ;;  %p21_p0 = scmp.ge.s32.totalorder %s2543_s19, 6  }
 0x1b1   : > { %s3044_s15 = smov %s2483_s16  ;;  %s3045_s16 = smov %s2487_s17 }
 0x1b2   : > { %s3047_s18 = smov %s2543_s19  ;;  %23 = sbr.rel (!%p21_p0) target bundleno = 11 (0xb), region = 110 }
 0x1b6   : > { %s3046_s17 = smov %s3043_s13 }
 0x1b7   :  { %1452 = vsyncpa [#allocation3], 1 }
 0x1b8   :  { %1454 = vsyncpa [#allocation3 + $0x1], 1 }
 0x1b9   :  { %1455 = vsyncpa [#allocation6], 1 }
 0x1ba   :  { %1457 = vsyncpa [#allocation6 + $0x1], 1 }
 0x1bb   :  { %1458 = vsyncpa [#allocation9], 1 }
 0x1bc   :  { %1460 = vsyncpa [#allocation9 + $0x1], 1 }
 0x1bd   :  { %1461 = vsyncpa [#allocation4], 1 }
 0x1be   :  { %1463 = vsyncpa [#allocation4 + $0x1], 1 }

</bundles_post_ra>
